<compile_context>
chip_gen: v6e
topology: v6e:2x2x1
jax: 0.10.0
libtpu: 0.0.40
codegen_flags: <defaults>
</compile_context>

<pallas_src>
import jax
import jax.numpy as jnp
import numpy as np
from jax.experimental import pallas as pl
from jax.experimental.pallas import tpu as pltpu

B, C, H, W = 8, 4, 16, 16
K = C * H * W            # 1024 flattened features per image
N_MAX = 8                # padded max detections per image (the "list" length)
D = 32                   # per-detection feature width == outputs[i].shape[1]
N_OUT = N_MAX * D        # 256 (lane-dense)
SEL_W = 128              # lane-dense padded width for the selected-row output


def wrapper_head_kernel(counts_ref, x_ref, w_ref, det_ref, sel_ref):
    # Entire problem is VMEM-resident: one MXU matmul, f32 accumulate,
    # written straight into the f32 output (no scratch accumulator).
    y = jnp.dot(x_ref[...], w_ref[...],
                preferred_element_type=jnp.float32)        # (B, N_OUT) f32
    det_ref[...] = y

    # WrapperModel semantics: row i of the result is outputs[i][0]
    # (detections[i, 0, :]) if image i has detections, else zeros.
    # Store a lane-dense (B, 128) slab; only the first D lanes are meaningful
    # and the JAX wrapper slices them out.
    sel_ref[...] = y[:, :SEL_W]

    # Zero the rows of images that produced no detections (the else-branch).
    # counts lives in SMEM (scalar prefetch) -> pure scalar reads here.
    for i in range(B):
        @pl.when(counts_ref[i] == 0)
        def _(i=i):
            sel_ref[pl.ds(i, 1), :] = jnp.zeros((1, SEL_W), sel_ref.dtype)


def wrapper_model(x_nchw, w_bf16, counts):
    x_flat = x_nchw.reshape(B, K).astype(jnp.bfloat16)
    counts_i32 = counts.astype(jnp.int32)                  # (B,) -> SMEM

    det, sel_padded = pl.pallas_call(
        wrapper_head_kernel,
        out_shape=(jax.ShapeDtypeStruct((B, N_OUT), jnp.float32),
                   jax.ShapeDtypeStruct((B, SEL_W), jnp.float32)),
        grid_spec=pltpu.PrefetchScalarGridSpec(
            num_scalar_prefetch=1,                         # counts -> SMEM
            grid=(1,),                                     # single resident block
            in_specs=[
                pl.BlockSpec((B, K), lambda i, counts: (0, 0)),       # x (bf16)
                pl.BlockSpec((K, N_OUT), lambda i, counts: (0, 0)),   # w (bf16)
            ],
            out_specs=[
                pl.BlockSpec((B, N_OUT), lambda i, counts: (0, 0)),   # detections
                pl.BlockSpec((B, SEL_W), lambda i, counts: (0, 0)),   # selected rows
            ],
        ),
        compiler_params=pltpu.CompilerParams(
            dimension_semantics=("arbitrary",)),
    )(counts_i32, x_flat, w_bf16)

    # WrapperModel.forward() return value: (B, D) selected first-detection rows.
    sel = sel_padded[:, :D]
    return det, sel


def reference(x_nchw, w, counts):
    det = (x_nchw.reshape(B, K).astype(jnp.float32)
           @ w.astype(jnp.float32)).reshape(B, N_MAX, D)
    rows = []
    for i in range(B):
        if int(counts[i]) != 0:
            rows.append(det[i, 0][None, :])
        else:
            rows.append(jnp.zeros((1, D), jnp.float32))
    return jnp.concatenate(rows, axis=0)


if __name__ == "__main__":
    key = jax.random.PRNGKey(0)
    kx, kw = jax.random.split(key)
    x = jax.random.normal(kx, (B, C, H, W), dtype=jnp.float32)
    # Detection-head weight stored bf16 (streamed bf16, accumulated f32).
    w = (jax.random.normal(kw, (K, N_OUT), dtype=jnp.float32) * 0.02
         ).astype(jnp.bfloat16)
    # Synthetic per-image detection counts from the (synthetic) inner model;
    # a mix of empty and non-empty images exercises both wrapper branches.
    counts = jnp.array([5, 0, 3, 0, 1, 7, 0, 2], dtype=jnp.int32)

    det, sel = wrapper_model(x, w, counts)
    sel = jax.block_until_ready(sel)

    ref = reference(x, w, counts)
    np.testing.assert_allclose(np.asarray(sel), np.asarray(ref),
                               rtol=2e-2, atol=2e-2)
    assert sel.shape == (B, D)
    print("KERNEL_OK")
</pallas_src>

<mosaic_0001>
module attributes {stable_mosaic.version = 11 : i64} {
  func.func @wrapper_head_kernel(%arg0: i32, %arg1: memref<8xi32, #tpu.memory_space<smem>>, %arg2: memref<8x1024xbf16, #tpu.memory_space<vmem>>, %arg3: memref<1024x256xbf16, #tpu.memory_space<vmem>>, %arg4: memref<8x256xf32, #tpu.memory_space<vmem>>, %arg5: memref<8x128xf32, #tpu.memory_space<vmem>>) attributes {dimension_semantics = [#tpu.dimension_semantics<arbitrary>], iteration_bounds = array<i64: 1>, scalar_prefetch = 1 : i64, scratch_operands = 0 : i64, tpu.core_type = #tpu.core_type<tc>, window_params = [{pipeline_mode = #tpu.pipeline_mode<synchronous>, transform_indices = @transform_0, window_bounds = array<i64: 8, 1024>}, {pipeline_mode = #tpu.pipeline_mode<synchronous>, transform_indices = @transform_1, window_bounds = array<i64: 1024, 256>}, {pipeline_mode = #tpu.pipeline_mode<synchronous>, transform_indices = @transform_2, window_bounds = array<i64: 8, 256>}, {pipeline_mode = #tpu.pipeline_mode<synchronous>, transform_indices = @transform_3, window_bounds = array<i64: 8, 128>}]} {
    %c0 = arith.constant 0 : index
    %c0_0 = arith.constant 0 : index
    %0 = vector.load %arg2[%c0, %c0_0] : memref<8x1024xbf16, #tpu.memory_space<vmem>>, vector<8x1024xbf16>
    %c0_1 = arith.constant 0 : index
    %c0_2 = arith.constant 0 : index
    %1 = vector.load %arg3[%c0_1, %c0_2] : memref<1024x256xbf16, #tpu.memory_space<vmem>>, vector<1024x256xbf16>
    %cst = arith.constant dense<0.000000e+00> : vector<8x256xf32>
    %2 = tpu.matmul %0, %1, %cst {dimension_numbers = #tpu.dot_dimension_numbers<[1], [0], [0], [1], [0, 0, 1, 1], [], []>} : vector<8x1024xbf16>, vector<1024x256xbf16>, vector<8x256xf32> -> vector<8x256xf32>
    %c0_3 = arith.constant 0 : index
    %c0_4 = arith.constant 0 : index
    %3 = vector.load %arg4[%c0_3, %c0_4] : memref<8x256xf32, #tpu.memory_space<vmem>>, vector<8x256xf32>
    tpu.vector_store %arg4[%c0_3, %c0_4], %2 {strides = array<i32>} : memref<8x256xf32, #tpu.memory_space<vmem>>, vector<8x256xf32>,
    %4 = vector.extract_strided_slice %2 {offsets = [0, 0], sizes = [8, 128], strides = [1, 1]} : vector<8x256xf32> to vector<8x128xf32>
    %c0_5 = arith.constant 0 : index
    %c0_6 = arith.constant 0 : index
    %5 = vector.load %arg5[%c0_5, %c0_6] : memref<8x128xf32, #tpu.memory_space<vmem>>, vector<8x128xf32>
    tpu.vector_store %arg5[%c0_5, %c0_6], %4 {strides = array<i32>} : memref<8x128xf32, #tpu.memory_space<vmem>>, vector<8x128xf32>,
    %c0_7 = arith.constant 0 : index
    %6 = memref.load %arg1[%c0_7] : memref<8xi32, #tpu.memory_space<smem>>
    %c0_i32 = arith.constant 0 : i32
    %7 = arith.cmpi eq, %6, %c0_i32 : i32
    %8 = arith.extui %7 : i1 to i32
    %c0_i32_8 = arith.constant 0 : i32
    %9 = arith.cmpi ne, %8, %c0_i32_8 : i32
    scf.if %9 {
      %cst_23 = arith.constant 0.000000e+00 : f32
      %38 = vector.broadcast %cst_23 : f32 to vector<1x128xf32>
      %c0_24 = arith.constant 0 : index
      %c0_25 = arith.constant 0 : index
      %39 = vector.load %arg5[%c0_24, %c0_25] : memref<8x128xf32, #tpu.memory_space<vmem>>, vector<1x128xf32>
      tpu.vector_store %arg5[%c0_24, %c0_25], %38 {strides = array<i32>} : memref<8x128xf32, #tpu.memory_space<vmem>>, vector<1x128xf32>,
    } else {
    }
    %c1 = arith.constant 1 : index
    %10 = memref.load %arg1[%c1] : memref<8xi32, #tpu.memory_space<smem>>
    %c0_i32_9 = arith.constant 0 : i32
    %11 = arith.cmpi eq, %10, %c0_i32_9 : i32
    %12 = arith.extui %11 : i1 to i32
    %c0_i32_10 = arith.constant 0 : i32
    %13 = arith.cmpi ne, %12, %c0_i32_10 : i32
    scf.if %13 {
      %cst_23 = arith.constant 0.000000e+00 : f32
      %38 = vector.broadcast %cst_23 : f32 to vector<1x128xf32>
      %c1_24 = arith.constant 1 : index
      %c0_25 = arith.constant 0 : index
      %39 = vector.load %arg5[%c1_24, %c0_25] : memref<8x128xf32, #tpu.memory_space<vmem>>, vector<1x128xf32>
      tpu.vector_store %arg5[%c1_24, %c0_25], %38 {strides = array<i32>} : memref<8x128xf32, #tpu.memory_space<vmem>>, vector<1x128xf32>,
    } else {
    }
    %c2 = arith.constant 2 : index
    %14 = memref.load %arg1[%c2] : memref<8xi32, #tpu.memory_space<smem>>
    %c0_i32_11 = arith.constant 0 : i32
    %15 = arith.cmpi eq, %14, %c0_i32_11 : i32
    %16 = arith.extui %15 : i1 to i32
    %c0_i32_12 = arith.constant 0 : i32
    %17 = arith.cmpi ne, %16, %c0_i32_12 : i32
    scf.if %17 {
      %cst_23 = arith.constant 0.000000e+00 : f32
      %38 = vector.broadcast %cst_23 : f32 to vector<1x128xf32>
      %c2_24 = arith.constant 2 : index
      %c0_25 = arith.constant 0 : index
      %39 = vector.load %arg5[%c2_24, %c0_25] : memref<8x128xf32, #tpu.memory_space<vmem>>, vector<1x128xf32>
      tpu.vector_store %arg5[%c2_24, %c0_25], %38 {strides = array<i32>} : memref<8x128xf32, #tpu.memory_space<vmem>>, vector<1x128xf32>,
    } else {
    }
    %c3 = arith.constant 3 : index
    %18 = memref.load %arg1[%c3] : memref<8xi32, #tpu.memory_space<smem>>
    %c0_i32_13 = arith.constant 0 : i32
    %19 = arith.cmpi eq, %18, %c0_i32_13 : i32
    %20 = arith.extui %19 : i1 to i32
    %c0_i32_14 = arith.constant 0 : i32
    %21 = arith.cmpi ne, %20, %c0_i32_14 : i32
    scf.if %21 {
      %cst_23 = arith.constant 0.000000e+00 : f32
      %38 = vector.broadcast %cst_23 : f32 to vector<1x128xf32>
      %c3_24 = arith.constant 3 : index
      %c0_25 = arith.constant 0 : index
      %39 = vector.load %arg5[%c3_24, %c0_25] : memref<8x128xf32, #tpu.memory_space<vmem>>, vector<1x128xf32>
      tpu.vector_store %arg5[%c3_24, %c0_25], %38 {strides = array<i32>} : memref<8x128xf32, #tpu.memory_space<vmem>>, vector<1x128xf32>,
    } else {
    }
    %c4 = arith.constant 4 : index
    %22 = memref.load %arg1[%c4] : memref<8xi32, #tpu.memory_space<smem>>
    %c0_i32_15 = arith.constant 0 : i32
    %23 = arith.cmpi eq, %22, %c0_i32_15 : i32
    %24 = arith.extui %23 : i1 to i32
    %c0_i32_16 = arith.constant 0 : i32
    %25 = arith.cmpi ne, %24, %c0_i32_16 : i32
    scf.if %25 {
      %cst_23 = arith.constant 0.000000e+00 : f32
      %38 = vector.broadcast %cst_23 : f32 to vector<1x128xf32>
      %c4_24 = arith.constant 4 : index
      %c0_25 = arith.constant 0 : index
      %39 = vector.load %arg5[%c4_24, %c0_25] : memref<8x128xf32, #tpu.memory_space<vmem>>, vector<1x128xf32>
      tpu.vector_store %arg5[%c4_24, %c0_25], %38 {strides = array<i32>} : memref<8x128xf32, #tpu.memory_space<vmem>>, vector<1x128xf32>,
    } else {
    }
    %c5 = arith.constant 5 : index
    %26 = memref.load %arg1[%c5] : memref<8xi32, #tpu.memory_space<smem>>
    %c0_i32_17 = arith.constant 0 : i32
    %27 = arith.cmpi eq, %26, %c0_i32_17 : i32
    %28 = arith.extui %27 : i1 to i32
    %c0_i32_18 = arith.constant 0 : i32
    %29 = arith.cmpi ne, %28, %c0_i32_18 : i32
    scf.if %29 {
      %cst_23 = arith.constant 0.000000e+00 : f32
      %38 = vector.broadcast %cst_23 : f32 to vector<1x128xf32>
      %c5_24 = arith.constant 5 : index
      %c0_25 = arith.constant 0 : index
      %39 = vector.load %arg5[%c5_24, %c0_25] : memref<8x128xf32, #tpu.memory_space<vmem>>, vector<1x128xf32>
      tpu.vector_store %arg5[%c5_24, %c0_25], %38 {strides = array<i32>} : memref<8x128xf32, #tpu.memory_space<vmem>>, vector<1x128xf32>,
    } else {
    }
    %c6 = arith.constant 6 : index
    %30 = memref.load %arg1[%c6] : memref<8xi32, #tpu.memory_space<smem>>
    %c0_i32_19 = arith.constant 0 : i32
    %31 = arith.cmpi eq, %30, %c0_i32_19 : i32
    %32 = arith.extui %31 : i1 to i32
    %c0_i32_20 = arith.constant 0 : i32
    %33 = arith.cmpi ne, %32, %c0_i32_20 : i32
    scf.if %33 {
      %cst_23 = arith.constant 0.000000e+00 : f32
      %38 = vector.broadcast %cst_23 : f32 to vector<1x128xf32>
      %c6_24 = arith.constant 6 : index
      %c0_25 = arith.constant 0 : index
      %39 = vector.load %arg5[%c6_24, %c0_25] : memref<8x128xf32, #tpu.memory_space<vmem>>, vector<1x128xf32>
      tpu.vector_store %arg5[%c6_24, %c0_25], %38 {strides = array<i32>} : memref<8x128xf32, #tpu.memory_space<vmem>>, vector<1x128xf32>,
    } else {
    }
    %c7 = arith.constant 7 : index
    %34 = memref.load %arg1[%c7] : memref<8xi32, #tpu.memory_space<smem>>
    %c0_i32_21 = arith.constant 0 : i32
    %35 = arith.cmpi eq, %34, %c0_i32_21 : i32
    %36 = arith.extui %35 : i1 to i32
    %c0_i32_22 = arith.constant 0 : i32
    %37 = arith.cmpi ne, %36, %c0_i32_22 : i32
    scf.if %37 {
      %cst_23 = arith.constant 0.000000e+00 : f32
      %38 = vector.broadcast %cst_23 : f32 to vector<1x128xf32>
      %c7_24 = arith.constant 7 : index
      %c0_25 = arith.constant 0 : index
      %39 = vector.load %arg5[%c7_24, %c0_25] : memref<8x128xf32, #tpu.memory_space<vmem>>, vector<1x128xf32>
      tpu.vector_store %arg5[%c7_24, %c0_25], %38 {strides = array<i32>} : memref<8x128xf32, #tpu.memory_space<vmem>>, vector<1x128xf32>,
    } else {
    }
    return
  }
  func.func @transform_0(%arg0: i32, %arg1: memref<8xi32, #tpu.memory_space<smem>>) -> (i32, i32) {
    %c0_i32 = arith.constant 0 : i32
    %c0_i32_0 = arith.constant 0 : i32
    %c0_i32_1 = arith.constant 0 : i32
    return %c0_i32, %c0_i32_0 : i32, i32
  }
  func.func @transform_1(%arg0: i32, %arg1: memref<8xi32, #tpu.memory_space<smem>>) -> (i32, i32) {
    %c0_i32 = arith.constant 0 : i32
    %c0_i32_0 = arith.constant 0 : i32
    %c0_i32_1 = arith.constant 0 : i32
    return %c0_i32, %c0_i32_0 : i32, i32
  }
  func.func @transform_2(%arg0: i32, %arg1: memref<8xi32, #tpu.memory_space<smem>>) -> (i32, i32) {
    %c0_i32 = arith.constant 0 : i32
    %c0_i32_0 = arith.constant 0 : i32
    %c0_i32_1 = arith.constant 0 : i32
    return %c0_i32, %c0_i32_0 : i32, i32
  }
  func.func @transform_3(%arg0: i32, %arg1: memref<8xi32, #tpu.memory_space<smem>>) -> (i32, i32) {
    %c0_i32 = arith.constant 0 : i32
    %c0_i32_0 = arith.constant 0 : i32
    %c0_i32_1 = arith.constant 0 : i32
    return %c0_i32, %c0_i32_0 : i32, i32
  }
}

</mosaic_0001>

<bundles_post_ra>
// kernel: tpu_custom_call.1
= control target key start
LH: loop header
LB: loop body
LE: loop exit
PB: predicated region body
PF: predicated region fallthrough
CT: control target
= control target key end

     0   :  { %s1555_s15 = smov [#allocation3]   ;;  %s1625_s0 = inlined_call_operand.hbm [shape: s32[8], index: 0, kind: input, shape index: {}]   ;;  %s1626_s1 = inlined_call_operand.hbm [shape: bf16[8,1024], index: 1, kind: input, shape index: {}]   ;;  %s1627_s2 = inlined_call_operand.hbm [shape: bf16[1024,256], index: 2, kind: input, shape index: {}]   ;;  %s1628_s3 = inlined_call_operand.hbm [shape: f32[8,256], index: 3, kind: output, shape index: {0}]   ;;  %s1629_s4 = inlined_call_operand.hbm [shape: f32[8,128], index: 4, kind: output, shape index: {1}]  }
   0x1   :  { %11 = dma.hbm_to_smem %s1625_s0, 16, %s1555_s15, [#allocation2] }
   0x2   :  { %1545 = dma.done.wait [#allocation2], 16 }
   0x3   :  { %1546 = vsyncadd [#allocation2], 4294967280 }
   0x4   :  { %13 = sfence }
   0x5   :  { %14 = vsyncpa [#allocation5], 0 }
   0x6   :  { %15 = vsyncpa [#allocation8], 0 }
   0x7   :  { %16 = vsyncpa [#allocation6], 0 }
   0x8   :  { %17 = vsyncpa [#allocation11], 0  ;;  %s1556_s18 = smov [#allocation4]   ;;  %s1557_s20 = smov [#allocation7]  }
   0x9   :  { %s24_s19 = sshll.u32 %s1556_s18, 4  ;;  %s33_s21 = sshll.u32 %s1557_s20, 4  ;;  %s25_s19 = int_to_ptr.vmem [resolvable:$true] %s24_s19  ;;  %s34_s21 = int_to_ptr.vmem [resolvable:$true] %s33_s21 }
   0xa   :  { %s1473_s22 = scalar_lea.vmem %s25_s19, 512  ;;  %p1478_p1 = scmp.lt.s32.totalorder %s25_s19, %s25_s19 }
   0xb   :  { %p1474_p0 = scmp.ne.s32.totalorder %s25_s19, %s1473_s22  ;;  %p1479_p2 = scmp.lt.s32.totalorder %s1473_s22, %s1473_s22 }
   0xd   :  { %p1480_p3 = por %p1479_p2, %p1478_p1 }
   0xf   :  { %p1481_p4 = pnand %p1480_p3, %p1474_p0 }
  0x11   :  { %1484 = shalt.err (!%p1481_p4)
}
  0x12   :  { %27 = dma.hbm_to_vmem [thread:$0]  %s1626_s1, 512, %s25_s19, [#allocation5]  }
  0x13   :  { %s1493_s24 = scalar_lea.vmem %s34_s21, 16384  ;;  %p1498_p6 = scmp.lt.s32.totalorder %s34_s21, %s34_s21 }
  0x14   :  { %p1494_p5 = scmp.ne.s32.totalorder %s34_s21, %s1493_s24  ;;  %p1499_p7 = scmp.lt.s32.totalorder %s1493_s24, %s1493_s24 }
  0x16   :  { %p1500_p8 = por %p1499_p7, %p1498_p6 }
  0x18   :  { %p1501_p9 = pnand %p1500_p8, %p1494_p5 }
  0x1a   :  { %1504 = shalt.err (!%p1501_p9)
}
  0x1b   :  { %s1558_s25 = smov 128   ;;  %s1559_s26 = smov 8  }
  0x1c   :  { %39 = dma.hbm_to_vmem [thread:$0]  %s1627_s2, 16384, %s34_s21, [#allocation8], %s1558_s25, %s1558_s25, %s1559_s26  }
  0x1d   :  { %1547 = dma.done.wait [#allocation5], 512  }
  0x1e   :  { %1548 = vsyncadd [#allocation5], 4294966784 }
  0x1f   :  { %1549 = dma.done.wait [#allocation8], 16384  }
  0x20   :  { %1550 = vsyncadd [#allocation8], 4294950912  ;;  %s1604_s29 = sld [smem:[#allocation3]]  ;;  %v1257_v0 = vld [vmem:[#allocation7 + $0x74] ss:$8 sps:$4 sm:$0xff]   ;;  %v46_v46 = vld [vmem:[#allocation4] sm:$0xff] }
  0x21   :  { %v1259_v1 = vld [vmem:[#allocation7 + $0x174] ss:$8 sps:$4 sm:$0xff]   ;;  %846 = vmatprep.subr.bf16.mxu0 %v1257_v0  ;;  %v1261_v2 = vld [vmem:[#allocation7 + $0x70] ss:$8 sps:$4 sm:$0xff]   ;;  %v1263_v4 = vld [vmem:[#allocation7 + $0x64] ss:$8 sps:$4 sm:$0xff]   ;;  %v1092_v47 = vcombine.high %v46_v46, %v46_v46 }
  0x22   :  { %v1262_v3 = vld [vmem:[#allocation7 + $0x170] ss:$8 sps:$4 sm:$0xff]   ;;  %887 = vmatprep.subr.bf16.mxu1 %v1259_v1  ;;  %847 = vmatpush1.bf16.msra.mxu0 %v1261_v2  ;;  %v1265_v5 = vld [vmem:[#allocation7 + $0x164] ss:$8 sps:$4 sm:$0xff]   ;;  %v1267_v6 = vld [vmem:[#allocation7 + $0x60] ss:$8 sps:$4 sm:$0xff]  }
  0x23   :  { %888 = vmatpush1.bf16.msra.mxu1 %v1262_v3  ;;  %848 = vmatprep.subr.bf16.mxu0 %v1263_v4  ;;  %v1268_v7 = vld [vmem:[#allocation7 + $0x160] ss:$8 sps:$4 sm:$0xff]   ;;  %v1269_v8 = vld [vmem:[#allocation7 + $0x54] ss:$8 sps:$4 sm:$0xff]   ;;  %v1273_v10 = vld [vmem:[#allocation7 + $0x50] ss:$8 sps:$4 sm:$0xff]  }
  0x24   :  { %889 = vmatprep.subr.bf16.mxu1 %v1265_v5  ;;  %v1271_v9 = vld [vmem:[#allocation7 + $0x154] ss:$8 sps:$4 sm:$0xff]   ;;  %v1274_v11 = vld [vmem:[#allocation7 + $0x150] ss:$8 sps:$4 sm:$0xff]   ;;  %v1275_v12 = vld [vmem:[#allocation7 + $0x44] ss:$8 sps:$4 sm:$0xff]   ;;  %878 = vmatprep.mubr.bf16.mxu0 %v1092_v47 }
  0x25   :  { %v1277_v13 = vld [vmem:[#allocation7 + $0x144] ss:$8 sps:$4 sm:$0xff]   ;;  %v1279_v14 = vld [vmem:[#allocation7 + $0x40] ss:$8 sps:$4 sm:$0xff]   ;;  %v1281_v16 = vld [vmem:[#allocation7 + $0x34] ss:$8 sps:$4 sm:$0xff]  }
  0x26   :  { %849 = vmatpush1.bf16.msra.mxu0 %v1267_v6  ;;  %v1280_v15 = vld [vmem:[#allocation7 + $0x140] ss:$8 sps:$4 sm:$0xff]   ;;  %v1283_v17 = vld [vmem:[#allocation7 + $0x134] ss:$8 sps:$4 sm:$0xff]   ;;  %v1285_v18 = vld [vmem:[#allocation7 + $0x30] ss:$8 sps:$4 sm:$0xff]   ;;  %v1091_v6 = vcombine.low %v46_v46, %v46_v46 }
  0x27   :  { %890 = vmatpush1.bf16.msra.mxu1 %v1268_v7  ;;  %850 = vmatprep.subr.bf16.mxu0 %v1269_v8  ;;  %v1286_v19 = vld [vmem:[#allocation7 + $0x130] ss:$8 sps:$4 sm:$0xff]   ;;  %v1287_v20 = vld [vmem:[#allocation7 + $0x24] ss:$8 sps:$4 sm:$0xff]   ;;  %v1291_v22 = vld [vmem:[#allocation7 + $0x20] ss:$8 sps:$4 sm:$0xff]  }
  0x28   :  { %891 = vmatprep.subr.bf16.mxu1 %v1271_v9  ;;  %v1289_v21 = vld [vmem:[#allocation7 + $0x124] ss:$8 sps:$4 sm:$0xff]   ;;  %v1292_v23 = vld [vmem:[#allocation7 + $0x120] ss:$8 sps:$4 sm:$0xff]   ;;  %v1293_v24 = vld [vmem:[#allocation7 + $0x14] ss:$8 sps:$4 sm:$0xff]  }
  0x29   :  { %v1295_v25 = vld [vmem:[#allocation7 + $0x114] ss:$8 sps:$4 sm:$0xff]   ;;  %v1297_v26 = vld [vmem:[#allocation7 + $0x10] ss:$8 sps:$4 sm:$0xff]   ;;  %v1299_v28 = vld [vmem:[#allocation7 + $0x4] ss:$8 sps:$4 sm:$0xff]  }
  0x2a   :  { %851 = vmatpush1.bf16.msra.mxu0 %v1273_v10  ;;  %v1298_v27 = vld [vmem:[#allocation7 + $0x110] ss:$8 sps:$4 sm:$0xff]   ;;  %v1301_v29 = vld [vmem:[#allocation7 + $0x104] ss:$8 sps:$4 sm:$0xff]   ;;  %v1303_v30 = vld [vmem:[#allocation7] ss:$8 sps:$4 sm:$0xff]  }
  0x2b   :  { %892 = vmatpush1.bf16.msra.mxu1 %v1274_v11  ;;  %852 = vmatprep.subr.bf16.mxu0 %v1275_v12  ;;  %v1304_v31 = vld [vmem:[#allocation7 + $0x100] ss:$8 sps:$4 sm:$0xff]   ;;  %v1305_v32 = vld [vmem:[#allocation7 + $0xf4] ss:$8 sps:$4 sm:$0xff]   ;;  %v1309_v34 = vld [vmem:[#allocation7 + $0xf0] ss:$8 sps:$4 sm:$0xff]  }
  0x2c   :  { %893 = vmatprep.subr.bf16.mxu1 %v1277_v13  ;;  %v1307_v33 = vld [vmem:[#allocation7 + $0x1f4] ss:$8 sps:$4 sm:$0xff]   ;;  %v1310_v35 = vld [vmem:[#allocation7 + $0x1f0] ss:$8 sps:$4 sm:$0xff]   ;;  %v1311_v36 = vld [vmem:[#allocation7 + $0xe4] ss:$8 sps:$4 sm:$0xff]  }
  0x2d   :  { %v1313_v37 = vld [vmem:[#allocation7 + $0x1e4] ss:$8 sps:$4 sm:$0xff]   ;;  %v1315_v38 = vld [vmem:[#allocation7 + $0xe0] ss:$8 sps:$4 sm:$0xff]   ;;  %v1317_v40 = vld [vmem:[#allocation7 + $0xd4] ss:$8 sps:$4 sm:$0xff]  }
  0x2e   :  { %853 = vmatpush1.bf16.msra.mxu0 %v1279_v14  ;;  %v1316_v39 = vld [vmem:[#allocation7 + $0x1e0] ss:$8 sps:$4 sm:$0xff]   ;;  %v1319_v41 = vld [vmem:[#allocation7 + $0x1d4] ss:$8 sps:$4 sm:$0xff]   ;;  %v1321_v42 = vld [vmem:[#allocation7 + $0xd0] ss:$8 sps:$4 sm:$0xff]  }
  0x2f   :  { %894 = vmatpush1.bf16.msra.mxu1 %v1280_v15  ;;  %854 = vmatprep.subr.bf16.mxu0 %v1281_v16  ;;  %v1322_v43 = vld [vmem:[#allocation7 + $0x1d0] ss:$8 sps:$4 sm:$0xff]   ;;  %v1323_v44 = vld [vmem:[#allocation7 + $0xc4] ss:$8 sps:$4 sm:$0xff]   ;;  %v1327_v49 = vld [vmem:[#allocation7 + $0xc0] ss:$8 sps:$4 sm:$0xff]  }
  0x30   :  { %895 = vmatprep.subr.bf16.mxu1 %v1283_v17  ;;  %v1325_v45 = vld [vmem:[#allocation7 + $0x1c4] ss:$8 sps:$4 sm:$0xff]   ;;  %v1328_v50 = vld [vmem:[#allocation7 + $0x1c0] ss:$8 sps:$4 sm:$0xff]   ;;  %v1329_v52 = vld [vmem:[#allocation7 + $0xb4] ss:$8 sps:$4 sm:$0xff]  }
  0x31   :  { %v47_v48 = vld [vmem:[#allocation4 + $0x8] sm:$0xff]  ;;  %v1331_v53 = vld [vmem:[#allocation7 + $0x1b4] ss:$8 sps:$4 sm:$0xff]   ;;  %v1333_v54 = vld [vmem:[#allocation7 + $0xb0] ss:$8 sps:$4 sm:$0xff]   ;;  %p1227_p10 = scmp.ne.s32.totalorder %s1604_s29, 0 }
  0x32   :  { %855 = vmatpush1.bf16.msra.mxu0 %v1285_v18  ;;  %v1094_v51 = vcombine.high %v47_v48, %v47_v48  ;;  %v1334_v55 = vld [vmem:[#allocation7 + $0x1b0] ss:$8 sps:$4 sm:$0xff]   ;;  %v1335_v56 = vld [vmem:[#allocation7 + $0xa4] ss:$8 sps:$4 sm:$0xff]   ;;  %v1339_v58 = vld [vmem:[#allocation7 + $0xa0] ss:$8 sps:$4 sm:$0xff]   ;;  %v1093_v7 = vcombine.low %v47_v48, %v47_v48 }
  0x33   :  { %896 = vmatpush1.bf16.msra.mxu1 %v1286_v19  ;;  %856 = vmatprep.subr.bf16.mxu0 %v1287_v20  ;;  %v1337_v57 = vld [vmem:[#allocation7 + $0x1a4] ss:$8 sps:$4 sm:$0xff]   ;;  %v1340_v59 = vld [vmem:[#allocation7 + $0x1a0] ss:$8 sps:$4 sm:$0xff]   ;;  %v1341_v60 = vld [vmem:[#allocation7 + $0x94] ss:$8 sps:$4 sm:$0xff]  }
  0x34   :  { %897 = vmatprep.subr.bf16.mxu1 %v1289_v21  ;;  %919 = vmatprep.mubr.bf16.mxu1 %v1094_v51  ;;  %v1343_v61 = vld [vmem:[#allocation7 + $0x194] ss:$8 sps:$4 sm:$0xff]   ;;  %v1345_v62 = vld [vmem:[#allocation7 + $0x90] ss:$8 sps:$4 sm:$0xff]   ;;  %v1347_v0 = vld [vmem:[#allocation7 + $0x84] ss:$8 sps:$4 sm:$0xff]  }
  0x35   :  { %v1346_v63 = vld [vmem:[#allocation7 + $0x190] ss:$8 sps:$4 sm:$0xff]   ;;  %v1349_v1 = vld [vmem:[#allocation7 + $0x184] ss:$8 sps:$4 sm:$0xff]   ;;  %v1351_v2 = vld [vmem:[#allocation7 + $0x80] ss:$8 sps:$4 sm:$0xff]  }
  0x36   :  { %857 = vmatpush1.bf16.msra.mxu0 %v1291_v22  ;;  %v1352_v3 = vld [vmem:[#allocation7 + $0x180] ss:$8 sps:$4 sm:$0xff]   ;;  %v1359_v4 = vld [vmem:[#allocation7 + $0x274] ss:$8 sps:$4 sm:$0xff]   ;;  %v1357_v8 = vld [vmem:[#allocation7 + $0x270] ss:$8 sps:$4 sm:$0xff]  }
  0x37   :  { %898 = vmatpush1.bf16.msra.mxu1 %v1292_v23  ;;  %858 = vmatprep.subr.bf16.mxu0 %v1293_v24  ;;  %v1362_v5 = vld [vmem:[#allocation7 + $0x374] ss:$8 sps:$4 sm:$0xff]   ;;  %v1360_v9 = vld [vmem:[#allocation7 + $0x370] ss:$8 sps:$4 sm:$0xff]   ;;  %v1365_v10 = vld [vmem:[#allocation7 + $0x264] ss:$8 sps:$4 sm:$0xff]  }
  0x38   :  { %899 = vmatprep.subr.bf16.mxu1 %v1295_v25  ;;  %v1368_v11 = vld [vmem:[#allocation7 + $0x364] ss:$8 sps:$4 sm:$0xff]   ;;  %v1363_v12 = vld [vmem:[#allocation7 + $0x260] ss:$8 sps:$4 sm:$0xff]   ;;  %v1371_v14 = vld [vmem:[#allocation7 + $0x254] ss:$8 sps:$4 sm:$0xff]  }
  0x39   :  { %v1366_v13 = vld [vmem:[#allocation7 + $0x360] ss:$8 sps:$4 sm:$0xff]   ;;  %v1374_v15 = vld [vmem:[#allocation7 + $0x354] ss:$8 sps:$4 sm:$0xff]   ;;  %v1369_v16 = vld [vmem:[#allocation7 + $0x250] ss:$8 sps:$4 sm:$0xff]  }
  0x3a   :  { %859 = vmatpush1.bf16.msra.mxu0 %v1297_v26  ;;  %v1372_v17 = vld [vmem:[#allocation7 + $0x350] ss:$8 sps:$4 sm:$0xff]   ;;  %v1377_v18 = vld [vmem:[#allocation7 + $0x244] ss:$8 sps:$4 sm:$0xff]   ;;  %v1375_v20 = vld [vmem:[#allocation7 + $0x240] ss:$8 sps:$4 sm:$0xff]  }
  0x3b   :  { %900 = vmatpush1.bf16.msra.mxu1 %v1298_v27  ;;  %860 = vmatprep.subr.bf16.mxu0 %v1299_v28  ;;  %v1380_v19 = vld [vmem:[#allocation7 + $0x344] ss:$8 sps:$4 sm:$0xff]   ;;  %v1378_v21 = vld [vmem:[#allocation7 + $0x340] ss:$8 sps:$4 sm:$0xff]   ;;  %v1383_v22 = vld [vmem:[#allocation7 + $0x234] ss:$8 sps:$4 sm:$0xff]  }
  0x3c   :  { %901 = vmatprep.subr.bf16.mxu1 %v1301_v29  ;;  %v1386_v23 = vld [vmem:[#allocation7 + $0x334] ss:$8 sps:$4 sm:$0xff]   ;;  %v1381_v24 = vld [vmem:[#allocation7 + $0x230] ss:$8 sps:$4 sm:$0xff]   ;;  %v1389_v26 = vld [vmem:[#allocation7 + $0x224] ss:$8 sps:$4 sm:$0xff]  }
  0x3d   :  { %v1384_v25 = vld [vmem:[#allocation7 + $0x330] ss:$8 sps:$4 sm:$0xff]   ;;  %v1392_v27 = vld [vmem:[#allocation7 + $0x324] ss:$8 sps:$4 sm:$0xff]   ;;  %v1387_v28 = vld [vmem:[#allocation7 + $0x220] ss:$8 sps:$4 sm:$0xff]  }
  0x3e   :  { %861 = vmatpush1.bf16.msra.mxu0 %v1303_v30  ;;  %v1390_v29 = vld [vmem:[#allocation7 + $0x320] ss:$8 sps:$4 sm:$0xff]   ;;  %v1395_v30 = vld [vmem:[#allocation7 + $0x214] ss:$8 sps:$4 sm:$0xff]   ;;  %v1413_v46 = vld [vmem:[#allocation7 + $0x2e4] ss:$8 sps:$4 sm:$0xff]  }
  0x3f   :  { %902 = vmatpush1.bf16.msra.mxu1 %v1304_v31  ;;  %862 = vmatprep.subr.bf16.mxu0 %v1305_v32  ;;  %v1398_v31 = vld [vmem:[#allocation7 + $0x314] ss:$8 sps:$4 sm:$0xff]   ;;  %v1416_v47 = vld [vmem:[#allocation7 + $0x3e4] ss:$8 sps:$4 sm:$0xff]   ;;  %v1411_v48 = vld [vmem:[#allocation7 + $0x2e0] ss:$8 sps:$4 sm:$0xff]  }
  0x40   :  { %903 = vmatprep.subr.bf16.mxu1 %v1307_v33  ;;  %v1606_v32 = vld [vmem:[#allocation4 + $0x10] sm:$0xff]  ;;  %v1608_v33 = vld [vmem:[#allocation4 + $0x18] sm:$0xff] }
  0x41   :  { %v1422_v51 = vld [vmem:[#allocation7 + $0x3d4] ss:$8 sps:$4 sm:$0xff]  }
  0x42   :  { %863 = vmatpush2.bf16.msra.mxu0 %v1309_v34  ;;  %v1096_v34 = vcombine.high %v1606_v32, %v1606_v32 }
  0x43   :  { %904 = vmatpush2.bf16.msra.mxu1 %v1310_v35  ;;  %864 = vmatprep.subr.bf16.mxu0 %v1311_v36  ;;  %v1098_v35 = vcombine.high %v1608_v33, %v1608_v33  ;;  %v1393_v36 = vld [vmem:[#allocation7 + $0x210] ss:$8 sps:$4 sm:$0xff]  }
  0x44   :  { %905 = vmatprep.subr.bf16.mxu1 %v1313_v37  ;;  %v1396_v37 = vld [vmem:[#allocation7 + $0x310] ss:$8 sps:$4 sm:$0xff]  }
  0x46   :  { %865 = vmatpush2.bf16.msra.mxu0 %v1315_v38  ;;  %v1401_v38 = vld [vmem:[#allocation7 + $0x204] ss:$8 sps:$4 sm:$0xff]  }
  0x47   :  { %906 = vmatpush2.bf16.msra.mxu1 %v1316_v39  ;;  %866 = vmatprep.subr.bf16.mxu0 %v1317_v40  ;;  %v1404_v39 = vld [vmem:[#allocation7 + $0x304] ss:$8 sps:$4 sm:$0xff]   ;;  %v1399_v40 = vld [vmem:[#allocation7 + $0x200] ss:$8 sps:$4 sm:$0xff]  }
  0x48   :  { %907 = vmatprep.subr.bf16.mxu1 %v1319_v41  ;;  %v1402_v41 = vld [vmem:[#allocation7 + $0x300] ss:$8 sps:$4 sm:$0xff]  }
  0x4a   :  { %867 = vmatpush2.bf16.msra.mxu0 %v1321_v42  ;;  %v1407_v42 = vld [vmem:[#allocation7 + $0x2f4] ss:$8 sps:$4 sm:$0xff]  }
  0x4b   :  { %908 = vmatpush2.bf16.msra.mxu1 %v1322_v43  ;;  %868 = vmatprep.subr.bf16.mxu0 %v1323_v44  ;;  %v1410_v43 = vld [vmem:[#allocation7 + $0x3f4] ss:$8 sps:$4 sm:$0xff]   ;;  %v1405_v44 = vld [vmem:[#allocation7 + $0x2f0] ss:$8 sps:$4 sm:$0xff]  }
  0x4c   :  { %909 = vmatprep.subr.bf16.mxu1 %v1325_v45  ;;  %v1408_v45 = vld [vmem:[#allocation7 + $0x3f0] ss:$8 sps:$4 sm:$0xff]  }
  0x4e   :  { %869 = vmatpush2.bf16.msra.mxu0 %v1327_v49  ;;  %v1414_v49 = vld [vmem:[#allocation7 + $0x3e0] ss:$8 sps:$4 sm:$0xff]  }
  0x4f   :  { %910 = vmatpush2.bf16.msra.mxu1 %v1328_v50  ;;  %870 = vmatprep.subr.bf16.mxu0 %v1329_v52  ;;  %v1419_v50 = vld [vmem:[#allocation7 + $0x2d4] ss:$8 sps:$4 sm:$0xff]   ;;  %v1417_v52 = vld [vmem:[#allocation7 + $0x2d0] ss:$8 sps:$4 sm:$0xff]  }
  0x50   :  { %911 = vmatprep.subr.bf16.mxu1 %v1331_v53  ;;  %v1420_v53 = vld [vmem:[#allocation7 + $0x3d0] ss:$8 sps:$4 sm:$0xff]  }
  0x52   :  { %871 = vmatpush2.bf16.msra.mxu0 %v1333_v54  ;;  %v1425_v54 = vld [vmem:[#allocation7 + $0x2c4] ss:$8 sps:$4 sm:$0xff]  }
  0x53   :  { %912 = vmatpush2.bf16.msra.mxu1 %v1334_v55  ;;  %872 = vmatprep.subr.bf16.mxu0 %v1335_v56  ;;  %v1428_v55 = vld [vmem:[#allocation7 + $0x3c4] ss:$8 sps:$4 sm:$0xff]   ;;  %v1423_v56 = vld [vmem:[#allocation7 + $0x2c0] ss:$8 sps:$4 sm:$0xff]  }
  0x54   :  { %913 = vmatprep.subr.bf16.mxu1 %v1337_v57  ;;  %v1426_v57 = vld [vmem:[#allocation7 + $0x3c0] ss:$8 sps:$4 sm:$0xff]  }
  0x56   :  { %873 = vmatpush2.bf16.msra.mxu0 %v1339_v58  ;;  %v1431_v58 = vld [vmem:[#allocation7 + $0x2b4] ss:$8 sps:$4 sm:$0xff]  }
  0x57   :  { %914 = vmatpush2.bf16.msra.mxu1 %v1340_v59  ;;  %874 = vmatprep.subr.bf16.mxu0 %v1341_v60  ;;  %v1434_v59 = vld [vmem:[#allocation7 + $0x3b4] ss:$8 sps:$4 sm:$0xff]   ;;  %v1429_v60 = vld [vmem:[#allocation7 + $0x2b0] ss:$8 sps:$4 sm:$0xff]  }
  0x58   :  { %915 = vmatprep.subr.bf16.mxu1 %v1343_v61  ;;  %v1432_v61 = vld [vmem:[#allocation7 + $0x3b0] ss:$8 sps:$4 sm:$0xff]  }
  0x5a   :  { %875 = vmatpush2.bf16.msra.mxu0 %v1345_v62  ;;  %v1437_v62 = vld [vmem:[#allocation7 + $0x2a4] ss:$8 sps:$4 sm:$0xff]  }
  0x5b   :  { %916 = vmatpush2.bf16.msra.mxu1 %v1346_v63  ;;  %876 = vmatprep.subr.bf16.mxu0 %v1347_v0  ;;  %v1440_v63 = vld [vmem:[#allocation7 + $0x3a4] ss:$8 sps:$4 sm:$0xff]   ;;  %v1435_v0 = vld [vmem:[#allocation7 + $0x2a0] ss:$8 sps:$4 sm:$0xff]  }
  0x5c   :  { %917 = vmatprep.subr.bf16.mxu1 %v1349_v1  ;;  %v1438_v1 = vld [vmem:[#allocation7 + $0x3a0] ss:$8 sps:$4 sm:$0xff]  }
  0x5e   :  { %877 = vmatpush2.bf16.msra.mxu0 %v1351_v2  ;;  %v1443_v2 = vld [vmem:[#allocation7 + $0x294] ss:$8 sps:$4 sm:$0xff]  }
  0x5f   :  { %918 = vmatpush2.bf16.msra.mxu1 %v1352_v3  ;;  %928 = vmatprep.subr.bf16.mxu0 %v1359_v4  ;;  %v1446_v3 = vld [vmem:[#allocation7 + $0x394] ss:$8 sps:$4 sm:$0xff]   ;;  %v1441_v4 = vld [vmem:[#allocation7 + $0x290] ss:$8 sps:$4 sm:$0xff]  }
  0x60   :  { %969 = vmatprep.subr.bf16.mxu1 %v1362_v5  ;;  %v1444_v5 = vld [vmem:[#allocation7 + $0x390] ss:$8 sps:$4 sm:$0xff]  }
  0x61   :  { %879 = vmatmul.mubr.bf16.vlgmr.msra.gmra.mxu0 %v1091_v6  ;;  %v1449_v6 = vld [vmem:[#allocation7 + $0x284] ss:$8 sps:$4 sm:$0xff]  }
  0x62   :  { %920 = vmatmul.mubr.bf16.vlgmr.msra.gmra.mxu1 %v1093_v7  ;;  %929 = vmatpush1.bf16.msra.mxu0 %v1357_v8  ;;  %v1452_v7 = vld [vmem:[#allocation7 + $0x384] ss:$8 sps:$4 sm:$0xff]   ;;  %v1447_v8 = vld [vmem:[#allocation7 + $0x280] ss:$8 sps:$4 sm:$0xff]  }
  0x63   :  { %970 = vmatpush1.bf16.msra.mxu1 %v1360_v9  ;;  %930 = vmatprep.subr.bf16.mxu0 %v1365_v10  ;;  %v1450_v9 = vld [vmem:[#allocation7 + $0x380] ss:$8 sps:$4 sm:$0xff]   ;;  %v1095_v10 = vcombine.low %v1606_v32, %v1606_v32 }
  0x64   :  { %971 = vmatprep.subr.bf16.mxu1 %v1368_v11  ;;  %960 = vmatprep.mubr.bf16.mxu0 %v1096_v34  ;;  %v1097_v11 = vcombine.low %v1608_v33, %v1608_v33 }
  0x65   :  { %1001 = vmatprep.mubr.bf16.mxu1 %v1098_v35 }
  0x66   :  { %931 = vmatpush1.bf16.msra.mxu0 %v1363_v12 }
  0x67   :  { %972 = vmatpush1.bf16.msra.mxu1 %v1366_v13  ;;  %932 = vmatprep.subr.bf16.mxu0 %v1371_v14 }
  0x68   :  { %973 = vmatprep.subr.bf16.mxu1 %v1374_v15 }
  0x6a   :  { %933 = vmatpush1.bf16.msra.mxu0 %v1369_v16 }
  0x6b   :  { %974 = vmatpush1.bf16.msra.mxu1 %v1372_v17  ;;  %934 = vmatprep.subr.bf16.mxu0 %v1377_v18 }
  0x6c   :  { %975 = vmatprep.subr.bf16.mxu1 %v1380_v19 }
  0x6e   :  { %935 = vmatpush1.bf16.msra.mxu0 %v1375_v20 }
  0x6f   :  { %976 = vmatpush1.bf16.msra.mxu1 %v1378_v21  ;;  %936 = vmatprep.subr.bf16.mxu0 %v1383_v22 }
  0x70   :  { %977 = vmatprep.subr.bf16.mxu1 %v1386_v23 }
  0x72   :  { %937 = vmatpush1.bf16.msra.mxu0 %v1381_v24 }
  0x73   :  { %978 = vmatpush1.bf16.msra.mxu1 %v1384_v25  ;;  %938 = vmatprep.subr.bf16.mxu0 %v1389_v26 }
  0x74   :  { %979 = vmatprep.subr.bf16.mxu1 %v1392_v27 }
  0x76   :  { %939 = vmatpush1.bf16.msra.mxu0 %v1387_v28 }
  0x77   :  { %980 = vmatpush1.bf16.msra.mxu1 %v1390_v29  ;;  %940 = vmatprep.subr.bf16.mxu0 %v1395_v30 }
  0x78   :  { %981 = vmatprep.subr.bf16.mxu1 %v1398_v31 }
  0x7a   :  { %941 = vmatpush1.bf16.msra.mxu0 %v1393_v36 }
  0x7b   :  { %982 = vmatpush1.bf16.msra.mxu1 %v1396_v37  ;;  %942 = vmatprep.subr.bf16.mxu0 %v1401_v38 }
  0x7c   :  { %983 = vmatprep.subr.bf16.mxu1 %v1404_v39 }
  0x7e   :  { %943 = vmatpush1.bf16.msra.mxu0 %v1399_v40 }
  0x7f   :  { %984 = vmatpush1.bf16.msra.mxu1 %v1402_v41  ;;  %944 = vmatprep.subr.bf16.mxu0 %v1407_v42 }
  0x80   :  { %985 = vmatprep.subr.bf16.mxu1 %v1410_v43 }
  0x82   :  { %945 = vmatpush2.bf16.msra.mxu0 %v1405_v44 }
  0x83   :  { %986 = vmatpush2.bf16.msra.mxu1 %v1408_v45  ;;  %946 = vmatprep.subr.bf16.mxu0 %v1413_v46 }
  0x84   :  { %987 = vmatprep.subr.bf16.mxu1 %v1416_v47 }
  0x86   :  { %947 = vmatpush2.bf16.msra.mxu0 %v1411_v48 }
  0x87   :  { %988 = vmatpush2.bf16.msra.mxu1 %v1414_v49  ;;  %948 = vmatprep.subr.bf16.mxu0 %v1419_v50 }
  0x88   :  { %989 = vmatprep.subr.bf16.mxu1 %v1422_v51 }
  0x8a   :  { %949 = vmatpush2.bf16.msra.mxu0 %v1417_v52 }
  0x8b   :  { %990 = vmatpush2.bf16.msra.mxu1 %v1420_v53  ;;  %950 = vmatprep.subr.bf16.mxu0 %v1425_v54 }
  0x8c   :  { %991 = vmatprep.subr.bf16.mxu1 %v1428_v55 }
  0x8e   :  { %951 = vmatpush2.bf16.msra.mxu0 %v1423_v56 }
  0x8f   :  { %992 = vmatpush2.bf16.msra.mxu1 %v1426_v57  ;;  %952 = vmatprep.subr.bf16.mxu0 %v1431_v58 }
  0x90   :  { %993 = vmatprep.subr.bf16.mxu1 %v1434_v59 }
  0x92   :  { %953 = vmatpush2.bf16.msra.mxu0 %v1429_v60 }
  0x93   :  { %994 = vmatpush2.bf16.msra.mxu1 %v1432_v61  ;;  %954 = vmatprep.subr.bf16.mxu0 %v1437_v62 }
  0x94   :  { %995 = vmatprep.subr.bf16.mxu1 %v1440_v63 }
  0x96   :  { %955 = vmatpush2.bf16.msra.mxu0 %v1435_v0 }
  0x97   :  { %996 = vmatpush2.bf16.msra.mxu1 %v1438_v1  ;;  %956 = vmatprep.subr.bf16.mxu0 %v1443_v2 }
  0x98   :  { %997 = vmatprep.subr.bf16.mxu1 %v1446_v3 }
  0x9a   :  { %957 = vmatpush2.bf16.msra.mxu0 %v1441_v4 }
  0x9b   :  { %998 = vmatpush2.bf16.msra.mxu1 %v1444_v5  ;;  %958 = vmatprep.subr.bf16.mxu0 %v1449_v6 }
  0x9c   :  { %999 = vmatprep.subr.bf16.mxu1 %v1452_v7 }
  0x9e   :  { %959 = vmatpush2.bf16.msra.mxu0 %v1447_v8 }
  0x9f   :  { %1000 = vmatpush2.bf16.msra.mxu1 %v1450_v9 }
  0xa1   :  { %961 = vmatmul.mubr.bf16.vlgmr.msra.gmra.mxu0 %v1095_v10 }
  0xa2   :  { %1002 = vmatmul.mubr.bf16.vlgmr.msra.gmra.mxu1 %v1097_v11 }
 0x121   :  { %v880_v12 = vpop.f32.mrf.mxu0 }
 0x122   :  { %v921_v13 = vpop.f32.mrf.mxu1 }
 0x123   :  { %v882_v14 = vpop.f32.mrf.mxu0  ;;  %v922_v20 = vadd.f32 %v921_v13, %v880_v12 }
 0x124   :  { %v923_v15 = vpop.f32.mrf.mxu1 }
 0x125   :  { %v884_v16 = vpop.f32.mrf.mxu0  ;;  %v924_v23 = vadd.f32 %v923_v15, %v882_v14 }
 0x126   :  { %v925_v17 = vpop.f32.mrf.mxu1 }
 0x127   :  { %v885_v18 = vpop.f32.mrf.mxu0 }
 0x128   :  { %v926_v19 = vpop.f32.mrf.mxu1 }
 0x161   :  { %v962_v21 = vpop.f32.mrf.mxu0 }
 0x162   :  { %v1003_v22 = vpop.f32.mrf.mxu1  ;;  %v963_v24 = vadd.f32 %v962_v21, %v922_v20 }
 0x163   :  { %v964_v25 = vpop.f32.mrf.mxu0 }
 0x164   :  { %v1005_v26 = vpop.f32.mrf.mxu1  ;;  %v1004_v27 = vadd.f32 %v1003_v22, %v963_v24  ;;  %v965_v28 = vadd.f32 %v964_v25, %v924_v23  ;;  %1017 = sbr.rel (%p1227_p10) target bundleno = 363 (0x16b), region = 21 }
 0x165   :  { %v966_v29 = vpop.f32.mrf.mxu0 }
 0x166   :  { %v1007_v30 = vpop.f32.mrf.mxu1  ;;  %1010 = vst [vmem:[#allocation9] sm:$0xff] %v1004_v27  ;;  %1012 = vst [vmem:[#allocation10] sm:$0xff] %v1004_v27  ;;  %v1006_v31 = vadd.f32 %v1005_v26, %v965_v28 }
 0x167   :  { %v967_v32 = vpop.f32.mrf.mxu0 }
 0x168   :  { %v1008_v33 = vpop.f32.mrf.mxu1  ;;  %1011 = vst [vmem:[#allocation9 + $0x8] sm:$0xff] %v1006_v31 }
 0x169   :  { %v1560_v34 = vmov 0.0  }
 0x16a   :  { %1018 = vst [vmem:[#allocation10] sm:$0x1] %v1560_v34 }
 0x16b PF:  { %s1228_s1 = sld [smem:[#allocation3 + $0x1]] }
 0x171   :  { %p1229_p11 = scmp.ne.s32.totalorder %s1228_s1, 0 }
 0x173   :  { %1023 = sbr.rel (%p1229_p11) target bundleno = 378 (0x17a), region = 25 }
 0x178   :  { %v1561_v35 = vmov 0.0  }
 0x179   :  { %1024 = vst [vmem:[#allocation10 + $0x1] sm:$0x1] %v1561_v35 }
 0x17a PF:  { %s1230_s2 = sld [smem:[#allocation3 + $0x2]] }
 0x180   :  { %p1231_p12 = scmp.ne.s32.totalorder %s1230_s2, 0 }
 0x182   :  { %1029 = sbr.rel (%p1231_p12) target bundleno = 393 (0x189), region = 29 }
 0x187   :  { %v1562_v36 = vmov 0.0  }
 0x188   :  { %1030 = vst [vmem:[#allocation10 + $0x2] sm:$0x1] %v1562_v36 }
 0x189 PF:  { %s1232_s30 = sld [smem:[#allocation3 + $0x3]] }
 0x18f   :  { %p1233_p13 = scmp.ne.s32.totalorder %s1232_s30, 0 }
 0x191   :  { %1035 = sbr.rel (%p1233_p13) target bundleno = 408 (0x198), region = 33 }
 0x196   :  { %v1563_v37 = vmov 0.0  }
 0x197   :  { %1036 = vst [vmem:[#allocation10 + $0x3] sm:$0x1] %v1563_v37 }
 0x198 PF:  { %s1234_s5 = sld [smem:[#allocation3 + $0x4]] }
 0x19e   :  { %p1235_p0 = scmp.ne.s32.totalorder %s1234_s5, 0 }
 0x1a0   :  { %1041 = sbr.rel (%p1235_p0) target bundleno = 423 (0x1a7), region = 37 }
 0x1a5   :  { %v1564_v38 = vmov 0.0  }
 0x1a6   :  { %1042 = vst [vmem:[#allocation10 + $0x4] sm:$0x1] %v1564_v38 }
 0x1a7 PF:  { %s1236_s6 = sld [smem:[#allocation3 + $0x5]] }
 0x1ad   :  { %p1237_p1 = scmp.ne.s32.totalorder %s1236_s6, 0 }
 0x1af   :  { %1047 = sbr.rel (%p1237_p1) target bundleno = 438 (0x1b6), region = 41 }
 0x1b4   :  { %v1565_v39 = vmov 0.0  }
 0x1b5   :  { %1048 = vst [vmem:[#allocation10 + $0x5] sm:$0x1] %v1565_v39 }
 0x1b6 PF:  { %s1238_s7 = sld [smem:[#allocation3 + $0x6]] }
 0x1bc   :  { %p1239_p2 = scmp.ne.s32.totalorder %s1238_s7, 0 }
 0x1be   :  { %1053 = sbr.rel (%p1239_p2) target bundleno = 453 (0x1c5), region = 45 }
 0x1c3   :  { %v1566_v40 = vmov 0.0  }
 0x1c4   :  { %1054 = vst [vmem:[#allocation10 + $0x6] sm:$0x1] %v1566_v40 }
 0x1c5 PF:  { %s1240_s8 = sld [smem:[#allocation3 + $0x7]] }
 0x1cb   :  { %p1241_p3 = scmp.ne.s32.totalorder %s1240_s8, 0 }
 0x1cd   :  { %1059 = sbr.rel (%p1241_p3) target bundleno = 468 (0x1d4), region = 49 }
 0x1d2   :  { %v1567_v41 = vmov 0.0  }
 0x1d3   :  { %1060 = vst [vmem:[#allocation10 + $0x7] sm:$0x1] %v1567_v41 }
 0x1d4 PF:  { %s1568_s9 = smov [#allocation9]   ;;  %s1569_s11 = smov [#allocation10]  }
 0x1d5   :  { %s1067_s10 = sshll.u32 %s1568_s9, 4  ;;  %s1077_s12 = sshll.u32 %s1569_s11, 4  ;;  %s1068_s10 = int_to_ptr.vmem [resolvable:$true] %s1067_s10  ;;  %s1078_s12 = int_to_ptr.vmem [resolvable:$true] %s1077_s12 }
 0x1d6   :  { %s1505_s13 = scalar_lea.vmem %s1068_s10, 256  ;;  %p1510_p5 = scmp.lt.s32.totalorder %s1068_s10, %s1068_s10 }
 0x1d7   :  { %p1506_p4 = scmp.ne.s32.totalorder %s1068_s10, %s1505_s13  ;;  %p1511_p6 = scmp.lt.s32.totalorder %s1505_s13, %s1505_s13 }
 0x1d9   :  { %p1512_p7 = por %p1511_p6, %p1510_p5 }
 0x1db   :  { %p1513_p8 = pnand %p1512_p7, %p1506_p4 }
 0x1dd   :  { %1516 = shalt.err (!%p1513_p8)
}
 0x1de   :  { %1070 = dma.vmem_to_hbm [thread:$0]  %s1068_s10, 256, %s1628_s3, [#allocation6]  }
 0x1df   :  { %s1525_s16 = scalar_lea.vmem %s1078_s12, 128  ;;  %p1530_p10 = scmp.lt.s32.totalorder %s1078_s12, %s1078_s12 }
 0x1e0   :  { %p1526_p9 = scmp.ne.s32.totalorder %s1078_s12, %s1525_s16  ;;  %p1531_p11 = scmp.lt.s32.totalorder %s1525_s16, %s1525_s16 }
 0x1e2   :  { %p1532_p12 = por %p1531_p11, %p1530_p10 }
 0x1e4   :  { %p1533_p13 = pnand %p1532_p12, %p1526_p9 }
 0x1e6   :  { %1536 = shalt.err (!%p1533_p13)
}
 0x1e7   :  { %1080 = dma.vmem_to_hbm [thread:$0]  %s1078_s12, 128, %s1629_s4, [#allocation11]  }
 0x1e8   :  { %1551 = dma.done.wait [#allocation6], 256  }
 0x1e9   :  { %1552 = vsyncadd [#allocation6], 4294967040 }
 0x1ea   :  { %1553 = dma.done.wait [#allocation11], 128  }
 0x1eb   :  { %1554 = vsyncadd [#allocation11], 4294967168 }
 0x1ec   :  { %1087 = vsyncpa [#allocation5], 1 }
 0x1ed   :  { %1088 = vsyncpa [#allocation8], 1 }
 0x1ee   :  { %1089 = vsyncpa [#allocation6], 1 }
 0x1ef   :  { %1090 = vsyncpa [#allocation11], 1 }

</bundles_post_ra>
